<compile_context>
chip_gen: v6e
topology: v6e:2x2x1
jax: 0.10.0
libtpu: 0.0.40
codegen_flags: <defaults>
</compile_context>

<pallas_src>
import jax
import jax.numpy as jnp
from jax.experimental import pallas as pl
from jax.experimental.pallas import tpu as pltpu


def attention1d_kernel(h_ref, w_ref, r_ref, alpha_ref):
    # h_ref: (BB, T, C) VMEM (input dtype);  w_ref: (1, 1, C) VMEM (same dtype).
    h = h_ref[...]
    w = w_ref[...]

    # scores = tanh(H) . w over C, keepdims so T stays on the sublane axis
    # (lane reduce; no degenerate N=1 MXU matvec, no T lanes<->sublanes
    # relayout for the softmax).  tanh / multiply run in the input dtype;
    # the reduction accumulates in f32.
    m = jnp.tanh(h)
    scores = jnp.sum((m * w).astype(jnp.float32), axis=-1, keepdims=True)  # (BB,T,1)
    # NOTE: Linear bias intentionally omitted -- softmax over T is shift-invariant,
    # so a per-row constant added to every score cannot change alpha or r.

    # softmax over T (sublane reduces); reciprocal goes to the otherwise-idle EUP.
    mx = jnp.max(scores, axis=1, keepdims=True)             # (BB,1,1)
    e = jnp.exp(scores - mx)                                # (BB,T,1)
    denom = jnp.sum(e, axis=1, keepdims=True)               # (BB,1,1)
    alpha = e * pl.reciprocal(denom, approx=True)           # (BB,T,1) f32

    # r = sum_T( H * alpha ): alpha broadcasts along the lane (C) axis, the
    # multiply stays in the input dtype, accumulation over T is in f32.
    prod = (h * alpha.astype(h.dtype)).astype(jnp.float32)  # (BB,T,C)
    r_ref[...] = jnp.sum(prod, axis=1).astype(r_ref.dtype)  # (BB,C)

    # alpha output is (BB, T): a single (T sublanes -> lanes) relayout per step.
    alpha_ref[...] = alpha[:, :, 0].astype(alpha_ref.dtype)


def _choose_block_b(B, T, C, itemsize):
    """Batch rows per grid step.

    Peak VMEM per step is ~2x the (double-buffered) input block plus ~3x a f32
    (BB,T,C) intermediate slab.  Prefer >=2 grid steps (megacore on v7x,
    prefetch/writeback overlap everywhere) while keeping each H block >= ~1 MiB
    so the ~0.35us/step pipeline overhead stays amortized.
    """
    sub = 8 if itemsize >= 4 else (16 if itemsize == 2 else 32)  # sublane packing
    row_in = T * C * itemsize                 # one batch row of the input block
    row_peak = 2 * row_in + 3 * T * C * 4     # dbl-buffered input + f32 temporaries
    budget = 28 << 20                         # conservative across v5e/v6e/v7x
    hard_cap = 48 << 20                       # stay under v7x's 64 MiB physical VMEM
    bb = budget // max(1, row_peak)

    if bb >= B:
        # Whole batch fits comfortably in one block; still split into >=2 steps
        # when each half remains big enough to amortize per-step overhead.
        min_split_rows = max(1, (1 << 20) // max(1, row_in))
        if B >= 2 * sub and (B // 2) >= min_split_rows:
            half = -(-B // 2)
            return min(B, -(-half // sub) * sub)
        return B

    # Budget-limited: sublane-align BB (avoids masked partial writebacks on the
    # 2D output blocks) without blowing past the budget.
    if bb >= sub:
        return (bb // sub) * sub
    if B >= sub and sub * row_peak <= hard_cap:
        return sub
    # A single (T, C) row is already near/over budget: fall back to tiny blocks.
    # TODO(synk): for extreme T*C, add a second 'arbitrary' grid axis over T with
    # an online softmax / r accumulator instead of one oversized row block.
    return max(1, min(bb, B))


def attention1d(H, weight, bias=None, block_b=None):
    """H: (B, T, C); weight: (1, C) (PyTorch nn.Linear layout); bias: (1,).

    The bias is accepted for API parity but unused: softmax over T is
    shift-invariant, so it cannot affect alpha or r."""
    del bias
    B, T, C = H.shape
    itemsize = jnp.dtype(H.dtype).itemsize
    BB = _choose_block_b(B, T, C, itemsize) if block_b is None else block_b

    # Explicit scoped-VMEM limit sized from the actual block (input double-buffer
    # + f32 intermediates + small double-buffered outputs), clamped to a range
    # that is safe on v5e (16 MiB default) through v7x (64 MiB physical).
    peak = (2 * BB * T * C * itemsize        # H block, double-buffered
            + 3 * BB * T * C * 4             # f32 intermediates (tanh/prod/exp)
            + 2 * BB * (T + C) * itemsize)   # r / alpha blocks, double-buffered
    vmem_limit = int(min(60 << 20, max(32 << 20, 2 * peak)))

    w3 = weight.reshape(1, 1, C).astype(H.dtype)

    r, alpha = pl.pallas_call(
        attention1d_kernel,
        out_shape=(
            jax.ShapeDtypeStruct((B, C), H.dtype),
            jax.ShapeDtypeStruct((B, T), H.dtype),
        ),
        grid=(pl.cdiv(B, BB),),
        in_specs=[
            pl.BlockSpec((BB, T, C), lambda b: (b, 0, 0)),   # H block
            pl.BlockSpec((1, 1, C), lambda b: (0, 0, 0)),    # weight row (broadcast)
        ],
        out_specs=(
            pl.BlockSpec((BB, C), lambda b: (b, 0)),         # r
            pl.BlockSpec((BB, T), lambda b: (b, 0)),         # alpha
        ),
        compiler_params=pltpu.CompilerParams(
            dimension_semantics=("parallel",),
            vmem_limit_bytes=vmem_limit),
    )(H, w3)
    return r, alpha


def attention1d_ref(H, weight, bias):
    # plain-JAX reference matching the PyTorch forward (bias included).
    M = jnp.tanh(H.astype(jnp.float32))
    scores = jnp.einsum("btc,oc->bto", M, weight.astype(jnp.float32))[..., 0]
    scores = scores + bias.astype(jnp.float32)[0]
    alpha = jax.nn.softmax(scores, axis=1)
    r = jnp.sum(H.astype(jnp.float32) * alpha[..., None], axis=1)
    return r.astype(H.dtype), alpha.astype(H.dtype)


if __name__ == "__main__":
    B, T, C = 2, 8, 32   # batch, seq, hidden (in_channel = C)

    key = jax.random.PRNGKey(0)
    k_h, k_w, k_b = jax.random.split(key, 3)

    H = jax.random.normal(k_h, (B, T, C), dtype=jnp.float32)
    # deterministic nn.Linear(C, 1)-shaped params: weight (1, C), bias (1,)
    bound = 1.0 / (C ** 0.5)
    weight = jax.random.uniform(k_w, (1, C), jnp.float32, -bound, bound)
    bias = jax.random.uniform(k_b, (1,), jnp.float32, -bound, bound)

    r, alpha = attention1d(H, weight, bias)
    jax.block_until_ready((r, alpha))

    r_ref, alpha_ref = attention1d_ref(H, weight, bias)
    # Tolerance loosened (2e-3) for the EUP approximate reciprocal in the softmax.
    assert jnp.allclose(r, r_ref, atol=2e-3, rtol=2e-3), "r mismatch"
    assert jnp.allclose(alpha, alpha_ref, atol=2e-3, rtol=2e-3), "alpha mismatch"

    print("KERNEL_OK")
</pallas_src>

<mosaic_0001>
module attributes {stable_mosaic.version = 11 : i64} {
  func.func @attention1d_kernel(%arg0: i32, %arg1: memref<2x8x32xf32, #tpu.memory_space<vmem>>, %arg2: memref<1x1x32xf32, #tpu.memory_space<vmem>>, %arg3: memref<2x32xf32, #tpu.memory_space<vmem>>, %arg4: memref<2x8xf32, #tpu.memory_space<vmem>>) attributes {dimension_semantics = [#tpu.dimension_semantics<parallel>], iteration_bounds = array<i64: 1>, scalar_prefetch = 0 : i64, scratch_operands = 0 : i64, tpu.core_type = #tpu.core_type<tc>, window_params = [{transform_indices = @transform_0, window_bounds = array<i64: 2, 8, 32>}, {pipeline_mode = #tpu.pipeline_mode<synchronous>, transform_indices = @transform_1, window_bounds = array<i64: 1, 1, 32>}, {transform_indices = @transform_2, window_bounds = array<i64: 2, 32>}, {transform_indices = @transform_3, window_bounds = array<i64: 2, 8>}]} {
    %c0 = arith.constant 0 : index
    %c0_0 = arith.constant 0 : index
    %c0_1 = arith.constant 0 : index
    %0 = vector.load %arg1[%c0, %c0_0, %c0_1] : memref<2x8x32xf32, #tpu.memory_space<vmem>>, vector<2x8x32xf32>
    %c0_2 = arith.constant 0 : index
    %c0_3 = arith.constant 0 : index
    %c0_4 = arith.constant 0 : index
    %1 = vector.load %arg2[%c0_2, %c0_3, %c0_4] : memref<1x1x32xf32, #tpu.memory_space<vmem>>, vector<1x1x32xf32>
    %2 = math.tanh %0 : vector<2x8x32xf32>
    %3 = vector.broadcast %1 : vector<1x1x32xf32> to vector<2x8x32xf32>
    %4 = arith.mulf %2, %3 : vector<2x8x32xf32>
    %cst = arith.constant dense<0.000000e+00> : vector<2x8xf32>
    %5 = vector.multi_reduction <add>, %4, %cst [2] : vector<2x8x32xf32> to vector<2x8xf32>
    %6 = vector.shape_cast %5 : vector<2x8xf32> to vector<2x8x1xf32>
    %cst_5 = arith.constant dense<0xFF800000> : vector<2x1xf32>
    %7 = vector.multi_reduction <maximumf>, %6, %cst_5 [1] : vector<2x8x1xf32> to vector<2x1xf32>
    %8 = vector.shape_cast %7 : vector<2x1xf32> to vector<2x1x1xf32>
    %9 = vector.broadcast %8 : vector<2x1x1xf32> to vector<2x8x1xf32>
    %10 = arith.subf %6, %9 : vector<2x8x1xf32>
    %11 = math.exp %10 : vector<2x8x1xf32>
    %cst_6 = arith.constant dense<0.000000e+00> : vector<2x1xf32>
    %12 = vector.multi_reduction <add>, %11, %cst_6 [1] : vector<2x8x1xf32> to vector<2x1xf32>
    %13 = vector.shape_cast %12 : vector<2x1xf32> to vector<2x1x1xf32>
    %14 = tpu.reciprocal %13 {approx = true} : vector<2x1x1xf32> -> vector<2x1x1xf32>
    %15 = vector.broadcast %14 : vector<2x1x1xf32> to vector<2x8x1xf32>
    %16 = arith.mulf %11, %15 : vector<2x8x1xf32>
    %17 = vector.broadcast %16 : vector<2x8x1xf32> to vector<2x8x32xf32>
    %18 = arith.mulf %0, %17 : vector<2x8x32xf32>
    %cst_7 = arith.constant dense<0.000000e+00> : vector<2x32xf32>
    %19 = vector.multi_reduction <add>, %18, %cst_7 [1] : vector<2x8x32xf32> to vector<2x32xf32>
    %c0_8 = arith.constant 0 : index
    %c0_9 = arith.constant 0 : index
    %20 = vector.load %arg3[%c0_8, %c0_9] : memref<2x32xf32, #tpu.memory_space<vmem>>, vector<2x32xf32>
    tpu.vector_store %arg3[%c0_8, %c0_9], %19 {strides = array<i32>} : memref<2x32xf32, #tpu.memory_space<vmem>>, vector<2x32xf32>,
    %21 = vector.shape_cast %16 : vector<2x8x1xf32> to vector<2x8xf32>
    %c0_10 = arith.constant 0 : index
    %c0_11 = arith.constant 0 : index
    %22 = vector.load %arg4[%c0_10, %c0_11] : memref<2x8xf32, #tpu.memory_space<vmem>>, vector<2x8xf32>
    tpu.vector_store %arg4[%c0_10, %c0_11], %21 {strides = array<i32>} : memref<2x8xf32, #tpu.memory_space<vmem>>, vector<2x8xf32>,
    return
  }
  func.func @transform_0(%arg0: i32) -> (i32, i32, i32) {
    %c0_i32 = arith.constant 0 : i32
    %c0_i32_0 = arith.constant 0 : i32
    %c0_i32_1 = arith.constant 0 : i32
    return %arg0, %c0_i32, %c0_i32_0 : i32, i32, i32
  }
  func.func @transform_1(%arg0: i32) -> (i32, i32, i32) {
    %c0_i32 = arith.constant 0 : i32
    %c0_i32_0 = arith.constant 0 : i32
    %c0_i32_1 = arith.constant 0 : i32
    %c0_i32_2 = arith.constant 0 : i32
    return %c0_i32, %c0_i32_0, %c0_i32_1 : i32, i32, i32
  }
  func.func @transform_2(%arg0: i32) -> (i32, i32) {
    %c0_i32 = arith.constant 0 : i32
    %c0_i32_0 = arith.constant 0 : i32
    return %arg0, %c0_i32 : i32, i32
  }
  func.func @transform_3(%arg0: i32) -> (i32, i32) {
    %c0_i32 = arith.constant 0 : i32
    %c0_i32_0 = arith.constant 0 : i32
    return %arg0, %c0_i32 : i32, i32
  }
}

</mosaic_0001>

<bundles_post_ra>
// kernel: tpu_custom_call.1
= control target key start
LH: loop header
LB: loop body
LE: loop exit
PB: predicated region body
PF: predicated region fallthrough
CT: control target
= control target key end

     0   :  { %9 = vsyncpa [#allocation3], 0  ;;  %s282_s0 = inlined_call_operand.hbm [shape: f32[2,8,32], index: 0, kind: input, shape index: {}]   ;;  %s283_s1 = inlined_call_operand.vmem [shape: f32[1,1,32], index: 1, kind: input, shape index: {}]   ;;  %s284_s2 = inlined_call_operand.hbm [shape: f32[2,32], index: 2, kind: output, shape index: {0}]   ;;  %s285_s3 = inlined_call_operand.hbm [shape: f32[2,8], index: 3, kind: output, shape index: {1}]  }
   0x1   :  { %10 = vsyncpa [#allocation4], 0 }
   0x2   :  { %11 = vsyncpa [#allocation7], 0  ;;  %s235_s12 = smov [#allocation2]  }
   0x3   :  { %s17_s13 = sshll.u32 %s235_s12, 4  ;;  %s18_s13 = int_to_ptr.vmem [resolvable:$true] %s17_s13 }
   0x4   :  { %s177_s14 = scalar_lea.vmem %s18_s13, 256  ;;  %p182_p1 = scmp.lt.s32.totalorder %s18_s13, %s18_s13 }
   0x5   :  { %p178_p0 = scmp.ne.s32.totalorder %s18_s13, %s177_s14  ;;  %p183_p2 = scmp.lt.s32.totalorder %s177_s14, %s177_s14 }
   0x7   :  { %p184_p3 = por %p183_p2, %p182_p1 }
   0x9   :  { %p185_p4 = pnand %p184_p3, %p178_p0 }
   0xb   :  { %188 = shalt.err (!%p185_p4)
}
   0xc   :  { %s236_s15 = smov 128   ;;  %s237_s16 = smov 8  }
   0xd   :  { %23 = dma.hbm_to_vmem [thread:$0]  %s282_s0, 256, %s18_s13, [#allocation3], %s236_s15, %s236_s15, %s237_s16  }
   0xe   :  { %229 = dma.done.wait [#allocation3], 256  }
   0xf   :  { %230 = vsyncadd [#allocation3], 4294967040  ;;  %v29_v0 = vld [vmem:[#allocation2] sm:$0xff]  ;;  %v263_v1 = vld [vmem:[#allocation2 + $0x8] sm:$0xff]  ;;  %vm42_vm0 = vcmask 261120   ;;  %v108_v41 = vlaneseq  ;;  %s238_s0 = smov [#allocation6]  }
  0x10   :  { %157 = vtanh.f32 %v29_v0  ;;  %v151_v2 = vld [vmem:[%s283_s1] ss:$0 sm:$0xff]  ;;  %s138_s1 = sshll.u32 %s238_s0, 4  ;;  %vm101_vm1 = vcmask 1041409   ;;  %vm120_vm2 = vcmask 58368   ;;  %s139_s1 = int_to_ptr.vmem [resolvable:$true] %s138_s1 }
  0x11   :  { %159 = vtanh.f32 %v263_v1  ;;  %v109_v42 = vand.u32 127, %v108_v41  ;;  %v111_v43 = vshrl.u32 %v108_v41, 7  ;;  %s189_s21 = scalar_lea.vmem %s139_s1, 32  ;;  %p194_p6 = scmp.lt.s32.totalorder %s139_s1, %s139_s1 }
  0x12   :  { %p190_p5 = scmp.ne.s32.totalorder %s139_s1, %s189_s21  ;;  %p195_p7 = scmp.lt.s32.totalorder %s189_s21, %s189_s21 }
  0x13   :  { %v112_v47 = vsub.s32 %v109_v42, %v111_v43 }
  0x14   :  { %p196_p8 = por %p195_p7, %p194_p6 }
  0x16   :  { %p197_p9 = pnand %p196_p8, %p190_p5 }
  0x1d   :  { %v158_v3 = vpop.eup %157 }
  0x1e   :  { %v160_v4 = vpop.eup %159  ;;  %v40_v5 = vmul.f32 %v158_v3, %v151_v2 }
  0x1f   :  { %v41_v6 = vmul.f32 %v160_v4, %v151_v2 }
  0x20   :  { %v43_v7 = vsel %vm42_vm0, %v40_v5, 0.0 }
  0x21   :  { %44 = vadd.xlane.f32.xlu0 %v43_v7  ;;  %v46_v8 = vsel %vm42_vm0, %v41_v6, 0.0 }
  0x25   :  { %47 = vadd.xlane.f32.xlu0 %v46_v8 }
  0xaa   :  { %v45_v9 = vpop.xlane.xlu0 %44 }
  0xab   :  { %v49_v10 = vrot.slane %v45_v9, 4 }
  0xad   :  { %v50_v11 = vmax.f32 %v45_v9, %v49_v10 }
  0xae   :  { %v48_v12 = vpop.xlane.xlu0 %47 }
  0xaf   :  { %v51_v13 = vrot.slane %v50_v11, 2  ;;  %v55_v14 = vrot.slane %v48_v12, 4 }
  0xb1   :  { %v52_v15 = vmax.f32 %v50_v11, %v51_v13  ;;  %v56_v16 = vmax.f32 %v48_v12, %v55_v14 }
  0xb3   :  { %v53_v17 = vrot.slane %v52_v15, 1  ;;  %v57_v18 = vrot.slane %v56_v16, 2 }
  0xb5   :  { %v54_v19 = vmax.f32 %v52_v15, %v53_v17  ;;  %v58_v20 = vmax.f32 %v56_v16, %v57_v18 }
  0xb7   :  { %v61_v21 = vsub.f32 %v45_v9, %v54_v19  ;;  %v59_v22 = vrot.slane %v58_v20, 1 }
  0xb9   :  { %v63_v23 = vmul.f32 1.442695, %v61_v21  ;;  %v60_v24 = vmax.f32 %v58_v20, %v59_v22 }
  0xbb   :  { %161 = vpow2.f32 %v63_v23  ;;  %v62_v25 = vsub.f32 %v48_v12, %v60_v24 }
  0xbd   :  { %v65_v26 = vmul.f32 1.442695, %v62_v25 }
  0xbf   :  { %163 = vpow2.f32 %v65_v26 }
  0xc8   :  { %v162_v27 = vpop.eup %161 }
  0xc9   :  { %v67_v28 = vrot.slane %v162_v27, 4 }
  0xcb   :  { %v68_v29 = vadd.f32 %v162_v27, %v67_v28 }
  0xcc   :  { %v164_v30 = vpop.eup %163 }
  0xcd   :  { %v73_v31 = vrot.slane %v164_v30, 4  ;;  %v69_v32 = vrot.slane %v68_v29, 2 }
  0xcf   :  { %v74_v33 = vadd.f32 %v164_v30, %v73_v31  ;;  %v70_v34 = vadd.f32 %v69_v32, %v68_v29 }
  0xd1   :  { %v71_v35 = vrot.slane %v70_v34, 1  ;;  %v75_v36 = vrot.slane %v74_v33, 2 }
  0xd3   :  { %v72_v37 = vadd.f32 %v71_v35, %v70_v34  ;;  %v76_v38 = vadd.f32 %v75_v36, %v74_v33 }
  0xd5   :  { %v77_v39 = vrot.slane %v76_v38, 1  ;;  %165 = vrcp.f32 %v72_v37 }
  0xd7   :  { %v78_v40 = vadd.f32 %v77_v39, %v76_v38 }
  0xd9   :  { %167 = vrcp.f32 %v78_v40 }
  0xe2   :  { %v166_v44 = vpop.eup %165 }
  0xe3   :  { %v81_v45 = vmul.f32 %v166_v44, %v162_v27 }
  0xe5   :  { %v83_v46 = vmul.f32 %v81_v45, %v29_v0  ;;  %v113_v53 = vrot.slane %v81_v45, %v112_v47 }
  0xe6   :  { %v168_v48 = vpop.eup %167 }
  0xe7   :  { %v82_v49 = vmul.f32 %v168_v48, %v164_v30  ;;  %v85_v50 = vsel %vm42_vm0, %v83_v46, 0.0 }
  0xe8   :  { %v86_v51 = vrot.slane %v85_v50, 4 }
  0xe9   :  { %v84_v52 = vmul.f32 %v82_v49, %v263_v1  ;;  %v117_v54 = vrot.slane %v82_v49, %v112_v47 }
  0xea   :  { %v87_v55 = vadd.f32 %v86_v51, %v85_v50 }
  0xeb   :  { %v92_v56 = vsel %vm42_vm0, %v84_v52, 0.0  ;;  %v118_v57 = vsel %vm101_vm1, %v117_v54, %v113_v53 }
  0xec   :  { %v88_v58 = vrot.slane %v87_v55, 2  ;;  %v93_v59 = vrot.slane %v92_v56, 4  ;;  %121 = vst.msk [vmem:[#allocation6] sm:$0x3] %vm120_vm2, %v118_v57 }
  0xed   :  { %200 = shalt.err (!%p197_p9)
}
  0xee   :  { %141 = dma.vmem_to_hbm [thread:$0]  %s139_s1, 32, %s285_s3, [#allocation7]   ;;  %v89_v60 = vadd.f32 %v88_v58, %v87_v55  ;;  %v94_v61 = vadd.f32 %v93_v59, %v92_v56  ;;  %vm104_vm3 = vcmask 254976  }
  0xef   :  { %s239_s24 = smov [#allocation5]  }
  0xf0   :  { %v95_v62 = vrot.slane %v94_v61, 2  ;;  %v90_v63 = vrot.slane %v89_v60, 1  ;;  %s128_s25 = sshll.u32 %s239_s24, 4  ;;  %s129_s25 = int_to_ptr.vmem [resolvable:$true] %s128_s25 }
  0xf1   :  { %s209_s26 = scalar_lea.vmem %s129_s25, 32  ;;  %p214_p11 = scmp.lt.s32.totalorder %s129_s25, %s129_s25 }
  0xf2   :  { %v96_v0 = vadd.f32 %v95_v62, %v94_v61  ;;  %v91_v2 = vadd.f32 %v90_v63, %v89_v60  ;;  %p210_p10 = scmp.ne.s32.totalorder %s129_s25, %s209_s26  ;;  %p215_p12 = scmp.lt.s32.totalorder %s209_s26, %s209_s26 }
  0xf4   :  { %v97_v1 = vrot.slane %v96_v0, 1  ;;  %p216_p13 = por %p215_p12, %p214_p11 }
  0xf6   :  { %v98_v3 = vadd.f32 %v97_v1, %v96_v0  ;;  %p217_p0 = pnand %p216_p13, %p210_p10 }
  0xf8   :  { %v102_v4 = vsel %vm101_vm1, %v98_v3, %v91_v2 }
  0xf9   :  { %105 = vst.msk [vmem:[#allocation5] sm:$0x3] %vm104_vm3, %v102_v4 }
  0xfa   :  { %220 = shalt.err (!%p217_p0)
}
  0xfb   :  { %131 = dma.vmem_to_hbm [thread:$0]  %s129_s25, 32, %s284_s2, [#allocation4]  }
  0xfc   :  { %231 = dma.done.wait [#allocation4], 32  }
  0xfd   :  { %232 = vsyncadd [#allocation4], 4294967264 }
  0xfe   :  { %233 = dma.done.wait [#allocation7], 32  }
  0xff   :  { %234 = vsyncadd [#allocation7], 4294967264 }
 0x100   :  { %148 = vsyncpa [#allocation3], 1 }
 0x101   :  { %149 = vsyncpa [#allocation4], 1 }
 0x102   :  { %150 = vsyncpa [#allocation7], 1 }

</bundles_post_ra>
